<compile_context>
chip_gen: v6e
topology: v6e:2x2x1
jax: 0.10.0
libtpu: 0.0.40
codegen_flags: <defaults>
</compile_context>

<pallas_src>
import jax
import jax.numpy as jnp
from jax.experimental import pallas as pl
from jax.experimental.pallas import tpu as pltpu

_LANE_ALIGN = 256   # MXU-256 friendly padding (v6e/v7x 2x256x256; harmless on v5e)
_ROW_ALIGN = 16     # bf16 packed sublane tile


def _round_up(x, m):
    return (x + m - 1) // m * m


def _pick_tile(dim_padded, preferred, step=_LANE_ALIGN):
    """Largest multiple of `step` <= preferred that divides dim_padded."""
    t = min(max(preferred, step), dim_padded)
    t = (t // step) * step
    while dim_padded % t != 0:
        t -= step
    return t


def _vmem_budget_bytes():
    """~85% of physical VMEM: leaves headroom for compiler scratch/semaphores."""
    try:
        cap = int(pltpu.get_tpu_info().vmem_capacity_bytes)
    except Exception:
        cap = 64 << 20   # conservative fallback (v7x-sized); still correct elsewhere
    return int(0.85 * cap)


# ----------------------------- kernels --------------------------------------


def _ffn_kernel_resident(x_ref, w1_ref, b1_ref, w2_ref, b2_ref, o_ref):
    # Whole (padded) W1/W2 are VMEM-resident (constant index maps): one pass per
    # row tile, no accumulator read-modify-write.
    h = jnp.dot(x_ref[...], w1_ref[...], preferred_element_type=jnp.float32)
    h = jnp.maximum(h + b1_ref[...], 0.0)
    # TODO(synk): training-mode stochastic dropout (pltpu.prng_*) not wired in;
    # eval-mode dropout is the identity.
    y = jnp.dot(h.astype(w2_ref.dtype), w2_ref[...],
                preferred_element_type=jnp.float32)
    o_ref[...] = (y + b2_ref[...]).astype(o_ref.dtype)


def _ffn_kernel_streamed(x_ref, w1_ref, b1_ref, w2_ref, b2_ref, o_ref, acc_ref):
    # d_ff streamed in chunks; partial products folded into a resident
    # (tm, d_model_p) f32 accumulator.
    j = pl.program_id(1)

    h = jnp.dot(x_ref[...], w1_ref[...], preferred_element_type=jnp.float32)
    h = jnp.maximum(h + b1_ref[...], 0.0)
    part = jnp.dot(h.astype(w2_ref.dtype), w2_ref[...],
                   preferred_element_type=jnp.float32)

    @pl.when(j == 0)
    def _():                      # first chunk: direct store (skip zero-init RMW)
        acc_ref[...] = part

    @pl.when(j > 0)
    def _():
        acc_ref[...] += part

    @pl.when(j == pl.num_programs(1) - 1)
    def _():
        o_ref[...] = (acc_ref[...] + b2_ref[...]).astype(o_ref.dtype)


# ----------------------------- wrappers -------------------------------------


def prepare_ffn_params(w1, b1, w2, b2, *, compute_dtype=jnp.bfloat16):
    """Cast + pad the weights ONCE (hoisted out of the per-call hot path).

    w1: [d_model, d_ff], b1: [d_ff], w2: [d_ff, d_model], b2: [d_model]
    (weights stored [in_features, out_features], i.e. transposed vs torch)."""
    d_model, d_ff = w1.shape
    d_model_p = _round_up(d_model, _LANE_ALIGN)
    d_ff_p = _round_up(d_ff, _LANE_ALIGN)
    w1_p = jnp.pad(w1.astype(compute_dtype),
                   ((0, d_model_p - d_model), (0, d_ff_p - d_ff)))
    w2_p = jnp.pad(w2.astype(compute_dtype),
                   ((0, d_ff_p - d_ff), (0, d_model_p - d_model)))
    b1_p = jnp.pad(b1.astype(jnp.float32), (0, d_ff_p - d_ff)).reshape(1, d_ff_p)
    b2_p = jnp.pad(b2.astype(jnp.float32),
                   (0, d_model_p - d_model)).reshape(1, d_model_p)
    return {"w1": w1_p, "b1": b1_p, "w2": w2_p, "b2": b2_p,
            "d_model": d_model, "d_ff": d_ff}


def positionwise_feed_forward(x, params, *, tile_m=512, tile_ff=1024):
    """x: [B, S, d_model]; params from prepare_ffn_params()."""
    B, S, d_model = x.shape
    assert d_model == params["d_model"]
    d_ff = params["d_ff"]
    w1_p, b1_p, w2_p, b2_p = params["w1"], params["b1"], params["w2"], params["b2"]
    d_model_p, d_ff_p = w1_p.shape
    compute_dtype = w1_p.dtype
    out_dtype = x.dtype
    out_isize = jnp.dtype(out_dtype).itemsize

    M = B * S
    M_r = _round_up(M, _ROW_ALIGN)
    budget = _vmem_budget_bytes()

    w_bytes = (w1_p.size * w1_p.dtype.itemsize + w2_p.size * w2_p.dtype.itemsize)
    b_bytes = b1_p.size * 4 + b2_p.size * 4

    def _resident_fp(tm):
        return (2 * (w_bytes + b_bytes)                 # weights (assume 2 bufs)
                + 2 * tm * d_model_p * 2                # x tile (bf16, 2 bufs)
                + 2 * tm * d_model_p * out_isize        # out tile (2 bufs)
                + tm * d_ff_p * (4 + 2)                 # h (f32) + bf16 recast
                + (2 << 20))                            # misc headroom

    def _streamed_fp(tm, tff):
        return (2 * (d_model_p * tff * 2 + tff * d_model_p * 2
                     + tff * 4 + d_model_p * 4)         # W1/W2/b1/b2 slices (2 bufs)
                + 2 * tm * d_model_p * 2                # x tile
                + 2 * tm * d_model_p * out_isize        # out tile
                + tm * d_model_p * 4                    # f32 accumulator scratch
                + tm * tff * (4 + 2)                    # h (f32) + bf16 recast
                + (2 << 20))

    # ---- row-tile / path selection ----
    cand = sorted({min(_round_up(t, _ROW_ALIGN), M_r)
                   for t in (tile_m, 1024, 768, 512, 384, 256, 128, 64, 32, 16)},
                  reverse=True)

    use_resident, tm, tff = False, None, None
    for t in cand:
        if _resident_fp(t) <= budget:
            use_resident, tm = True, t
            break
    if not use_resident:
        tm = next((t for t in cand if t <= 256), cand[-1])
        tff = _pick_tile(d_ff_p, _round_up(tile_ff, _LANE_ALIGN))
        while tff > _LANE_ALIGN and _streamed_fp(tm, tff) > budget:
            tff = _pick_tile(d_ff_p, tff - _LANE_ALIGN)

    M_p = _round_up(M, tm)
    if M_p // tm == 1 and tm >= 512:
        tm //= 2                      # >=2 row blocks so both v7x TCs get work
        M_p = _round_up(M, tm)
    n_row = M_p // tm

    # ---- pad activations (only if needed) ----
    x2d = x.reshape(M, d_model).astype(compute_dtype)
    if M_p != M or d_model_p != d_model:
        x2d = jnp.pad(x2d, ((0, M_p - M), (0, d_model_p - d_model)))

    # ---- grid / specs ----
    if use_resident:
        grid = (n_row,)
        in_specs = [
            pl.BlockSpec((tm, d_model_p), lambda i: (i, 0)),        # x rows
            pl.BlockSpec((d_model_p, d_ff_p), lambda i: (0, 0)),    # W1 (resident)
            pl.BlockSpec((1, d_ff_p), lambda i: (0, 0)),            # b1
            pl.BlockSpec((d_ff_p, d_model_p), lambda i: (0, 0)),    # W2 (resident)
            pl.BlockSpec((1, d_model_p), lambda i: (0, 0)),         # b2
        ]
        out_specs = pl.BlockSpec((tm, d_model_p), lambda i: (i, 0))
        scratch_shapes = []
        kernel = _ffn_kernel_resident
        dim_sem = ("parallel",)
        weight_reads = 1
    else:
        grid = (n_row, d_ff_p // tff)
        in_specs = [
            pl.BlockSpec((tm, d_model_p), lambda i, j: (i, 0)),     # x rows
            pl.BlockSpec((d_model_p, tff), lambda i, j: (0, j)),    # W1 slice
            pl.BlockSpec((1, tff), lambda i, j: (0, j)),            # b1 slice
            pl.BlockSpec((tff, d_model_p), lambda i, j: (j, 0)),    # W2 slice
            pl.BlockSpec((1, d_model_p), lambda i, j: (0, 0)),      # b2
        ]
        out_specs = pl.BlockSpec((tm, d_model_p), lambda i, j: (i, 0))
        scratch_shapes = [pltpu.VMEM((tm, d_model_p), jnp.float32)]
        kernel = _ffn_kernel_streamed
        dim_sem = ("parallel", "arbitrary")
        weight_reads = n_row                                        # W re-streamed per row tile

    vmem_limit = int(max(budget, 32 << 20))

    cost = pl.CostEstimate(
        flops=4 * M * d_model * d_ff,
        transcendentals=0,
        bytes_accessed=int(x2d.size * x2d.dtype.itemsize
                           + weight_reads * w_bytes + b_bytes
                           + M_p * d_model_p * out_isize),
    )

    out2d = pl.pallas_call(
        kernel,
        out_shape=jax.ShapeDtypeStruct((M_p, d_model_p), out_dtype),
        grid_spec=pltpu.PrefetchScalarGridSpec(
            num_scalar_prefetch=0,
            grid=grid,
            in_specs=in_specs,
            out_specs=out_specs,
            scratch_shapes=scratch_shapes,
        ),
        compiler_params=pltpu.CompilerParams(
            dimension_semantics=dim_sem,
            vmem_limit_bytes=vmem_limit,
        ),
        cost_estimate=cost,
    )(x2d, w1_p, b1_p, w2_p, b2_p)

    if M_p == M and d_model_p == d_model:
        return out2d.reshape(B, S, d_model)
    return out2d[:M, :d_model].reshape(B, S, d_model)


# ----------------------------- demo / test ----------------------------------

if __name__ == "__main__":
    # Small, module-consistent shapes: batch=2, seq=8, d_model=32, d_ff=64.
    B, S, d_model, d_ff = 2, 8, 32, 64

    key = jax.random.PRNGKey(0)
    kx, kw1, kb1, kw2, kb2 = jax.random.split(key, 5)

    x = jax.random.normal(kx, (B, S, d_model), dtype=jnp.float32)

    # Deterministic parameter init (PyTorch nn.Linear-style uniform bounds),
    # stored as [in_features, out_features] (transposed vs. torch's weight).
    bound1 = 1.0 / (d_model ** 0.5)
    w1 = jax.random.uniform(kw1, (d_model, d_ff), minval=-bound1, maxval=bound1,
                            dtype=jnp.float32)
    b1 = jax.random.uniform(kb1, (d_ff,), minval=-bound1, maxval=bound1,
                            dtype=jnp.float32)
    bound2 = 1.0 / (d_ff ** 0.5)
    w2 = jax.random.uniform(kw2, (d_ff, d_model), minval=-bound2, maxval=bound2,
                            dtype=jnp.float32)
    b2 = jax.random.uniform(kb2, (d_model,), minval=-bound2, maxval=bound2,
                            dtype=jnp.float32)

    params = prepare_ffn_params(w1, b1, w2, b2)       # cast+pad once (hoisted)
    out = positionwise_feed_forward(x, params)
    out = jax.block_until_ready(out)
    assert out.shape == (B, S, d_model)

    # Reference mirroring the kernel's numerics (bf16 MXU inputs, f32 accum).
    x2d = x.reshape(B * S, d_model)
    h_ref = jnp.maximum(
        jnp.dot(x2d.astype(jnp.bfloat16), w1.astype(jnp.bfloat16),
                preferred_element_type=jnp.float32) + b1, 0.0)
    ref_bf = (jnp.dot(h_ref.astype(jnp.bfloat16), w2.astype(jnp.bfloat16),
                      preferred_element_type=jnp.float32) + b2).reshape(B, S, d_model)
    assert jnp.allclose(out, ref_bf, atol=1e-3, rtol=1e-3), \
        "mismatch vs bf16-emulated reference"

    # Looser sanity check against pure-f32 PyTorch-equivalent math (eval dropout).
    ref_f32 = jnp.maximum(x @ w1 + b1, 0.0) @ w2 + b2
    assert jnp.allclose(out, ref_f32, atol=5e-2, rtol=5e-2), \
        "mismatch vs f32 reference"

    print("KERNEL_OK")
</pallas_src>

<mosaic_0001>
module attributes {stable_mosaic.version = 11 : i64} {
  func.func @_ffn_kernel_resident(%arg0: i32, %arg1: memref<16x256xbf16, #tpu.memory_space<vmem>>, %arg2: memref<256x256xbf16, #tpu.memory_space<vmem>>, %arg3: memref<1x256xf32, #tpu.memory_space<vmem>>, %arg4: memref<256x256xbf16, #tpu.memory_space<vmem>>, %arg5: memref<1x256xf32, #tpu.memory_space<vmem>>, %arg6: memref<16x256xf32, #tpu.memory_space<vmem>>) attributes {dimension_semantics = [#tpu.dimension_semantics<parallel>], iteration_bounds = array<i64: 1>, scalar_prefetch = 0 : i64, scratch_operands = 0 : i64, tpu.core_type = #tpu.core_type<tc>, window_params = [{transform_indices = @transform_0, window_bounds = array<i64: 16, 256>}, {pipeline_mode = #tpu.pipeline_mode<synchronous>, transform_indices = @transform_1, window_bounds = array<i64: 256, 256>}, {pipeline_mode = #tpu.pipeline_mode<synchronous>, transform_indices = @transform_2, window_bounds = array<i64: 1, 256>}, {pipeline_mode = #tpu.pipeline_mode<synchronous>, transform_indices = @transform_3, window_bounds = array<i64: 256, 256>}, {pipeline_mode = #tpu.pipeline_mode<synchronous>, transform_indices = @transform_4, window_bounds = array<i64: 1, 256>}, {transform_indices = @transform_5, window_bounds = array<i64: 16, 256>}]} {
    %c0 = arith.constant 0 : index
    %c0_0 = arith.constant 0 : index
    %0 = vector.load %arg1[%c0, %c0_0] : memref<16x256xbf16, #tpu.memory_space<vmem>>, vector<16x256xbf16>
    %c0_1 = arith.constant 0 : index
    %c0_2 = arith.constant 0 : index
    %1 = vector.load %arg2[%c0_1, %c0_2] : memref<256x256xbf16, #tpu.memory_space<vmem>>, vector<256x256xbf16>
    %cst = arith.constant dense<0.000000e+00> : vector<16x256xf32>
    %2 = tpu.matmul %0, %1, %cst {dimension_numbers = #tpu.dot_dimension_numbers<[1], [0], [0], [1], [0, 0, 1, 1], [], []>} : vector<16x256xbf16>, vector<256x256xbf16>, vector<16x256xf32> -> vector<16x256xf32>
    %c0_3 = arith.constant 0 : index
    %c0_4 = arith.constant 0 : index
    %3 = vector.load %arg3[%c0_3, %c0_4] : memref<1x256xf32, #tpu.memory_space<vmem>>, vector<1x256xf32>
    %4 = vector.broadcast %3 : vector<1x256xf32> to vector<16x256xf32>
    %5 = arith.addf %2, %4 : vector<16x256xf32>
    %cst_5 = arith.constant 0.000000e+00 : f32
    %6 = vector.broadcast %cst_5 : f32 to vector<16x256xf32>
    %7 = arith.maximumf %5, %6 : vector<16x256xf32>
    %8 = arith.truncf %7 : vector<16x256xf32> to vector<16x256xbf16>
    %c0_6 = arith.constant 0 : index
    %c0_7 = arith.constant 0 : index
    %9 = vector.load %arg4[%c0_6, %c0_7] : memref<256x256xbf16, #tpu.memory_space<vmem>>, vector<256x256xbf16>
    %cst_8 = arith.constant dense<0.000000e+00> : vector<16x256xf32>
    %10 = tpu.matmul %8, %9, %cst_8 {dimension_numbers = #tpu.dot_dimension_numbers<[1], [0], [0], [1], [0, 0, 1, 1], [], []>} : vector<16x256xbf16>, vector<256x256xbf16>, vector<16x256xf32> -> vector<16x256xf32>
    %c0_9 = arith.constant 0 : index
    %c0_10 = arith.constant 0 : index
    %11 = vector.load %arg5[%c0_9, %c0_10] : memref<1x256xf32, #tpu.memory_space<vmem>>, vector<1x256xf32>
    %12 = vector.broadcast %11 : vector<1x256xf32> to vector<16x256xf32>
    %13 = arith.addf %10, %12 : vector<16x256xf32>
    %c0_11 = arith.constant 0 : index
    %c0_12 = arith.constant 0 : index
    %14 = vector.load %arg6[%c0_11, %c0_12] : memref<16x256xf32, #tpu.memory_space<vmem>>, vector<16x256xf32>
    tpu.vector_store %arg6[%c0_11, %c0_12], %13 {strides = array<i32>} : memref<16x256xf32, #tpu.memory_space<vmem>>, vector<16x256xf32>,
    return
  }
  func.func @transform_0(%arg0: i32) -> (i32, i32) {
    %c0_i32 = arith.constant 0 : i32
    %c0_i32_0 = arith.constant 0 : i32
    return %arg0, %c0_i32 : i32, i32
  }
  func.func @transform_1(%arg0: i32) -> (i32, i32) {
    %c0_i32 = arith.constant 0 : i32
    %c0_i32_0 = arith.constant 0 : i32
    %c0_i32_1 = arith.constant 0 : i32
    return %c0_i32, %c0_i32_0 : i32, i32
  }
  func.func @transform_2(%arg0: i32) -> (i32, i32) {
    %c0_i32 = arith.constant 0 : i32
    %c0_i32_0 = arith.constant 0 : i32
    %c0_i32_1 = arith.constant 0 : i32
    return %c0_i32, %c0_i32_0 : i32, i32
  }
  func.func @transform_3(%arg0: i32) -> (i32, i32) {
    %c0_i32 = arith.constant 0 : i32
    %c0_i32_0 = arith.constant 0 : i32
    %c0_i32_1 = arith.constant 0 : i32
    return %c0_i32, %c0_i32_0 : i32, i32
  }
  func.func @transform_4(%arg0: i32) -> (i32, i32) {
    %c0_i32 = arith.constant 0 : i32
    %c0_i32_0 = arith.constant 0 : i32
    %c0_i32_1 = arith.constant 0 : i32
    return %c0_i32, %c0_i32_0 : i32, i32
  }
  func.func @transform_5(%arg0: i32) -> (i32, i32) {
    %c0_i32 = arith.constant 0 : i32
    %c0_i32_0 = arith.constant 0 : i32
    return %arg0, %c0_i32 : i32, i32
  }
}

</mosaic_0001>

<bundles_post_ra>
// kernel: tpu_custom_call.1
= control target key start
LH: loop header
LB: loop body
LE: loop exit
PB: predicated region body
PF: predicated region fallthrough
CT: control target
= control target key end

     0   :  { %10 = vsyncpa [#allocation3], 0  ;;  %s911_s0 = inlined_call_operand.hbm [shape: bf16[16,256], index: 0, kind: input, shape index: {}]   ;;  %s912_s1 = inlined_call_operand.hbm [shape: bf16[256,256], index: 1, kind: input, shape index: {}]   ;;  %s913_s2 = inlined_call_operand.vmem [shape: f32[1,256], index: 2, kind: input, shape index: {}]   ;;  %s914_s3 = inlined_call_operand.hbm [shape: bf16[256,256], index: 3, kind: input, shape index: {}]   ;;  %s915_s4 = inlined_call_operand.vmem [shape: f32[1,256], index: 4, kind: input, shape index: {}]   ;;  %s916_s5 = inlined_call_operand.hbm [shape: f32[16,256], index: 5, kind: output, shape index: {}]  }
   0x1   :  { %11 = vsyncpa [#allocation6], 0 }
   0x2   :  { %12 = vsyncpa [#allocation4], 0  ;;  %s855_s18 = smov [#allocation5]   ;;  %s856_s20 = smov [#allocation2]  }
   0x3   :  { %s30_s19 = sshll.u32 %s855_s18, 4  ;;  %s18_s21 = sshll.u32 %s856_s20, 4  ;;  %s31_s19 = int_to_ptr.vmem [resolvable:$true] %s30_s19  ;;  %s19_s21 = int_to_ptr.vmem [resolvable:$true] %s18_s21 }
   0x4   :  { %s777_s22 = scalar_lea.vmem %s31_s19, 4096  ;;  %p782_p1 = scmp.lt.s32.totalorder %s31_s19, %s31_s19 }
   0x5   :  { %p778_p0 = scmp.ne.s32.totalorder %s31_s19, %s777_s22  ;;  %p783_p2 = scmp.lt.s32.totalorder %s777_s22, %s777_s22 }
   0x7   :  { %p784_p3 = por %p783_p2, %p782_p1 }
   0x9   :  { %p785_p4 = pnand %p784_p3, %p778_p0 }
   0xb   :  { %788 = shalt.err (!%p785_p4)
}
   0xc   :  { %s857_s23 = smov 128   ;;  %s858_s24 = smov 8  }
   0xd   :  { %36 = dma.hbm_to_vmem [thread:$0]  %s912_s1, 4096, %s31_s19, [#allocation6], %s857_s23, %s857_s23, %s858_s24  }
   0xe   :  { %s797_s27 = scalar_lea.vmem %s19_s21, 256  ;;  %p802_p6 = scmp.lt.s32.totalorder %s19_s21, %s19_s21 }
   0xf   :  { %p798_p5 = scmp.ne.s32.totalorder %s19_s21, %s797_s27  ;;  %p803_p7 = scmp.lt.s32.totalorder %s797_s27, %s797_s27 }
  0x11   :  { %p804_p8 = por %p803_p7, %p802_p6 }
  0x13   :  { %p805_p9 = pnand %p804_p8, %p798_p5 }
  0x15   :  { %808 = shalt.err (!%p805_p9)
}
  0x16   :  { %24 = dma.hbm_to_vmem [thread:$0]  %s911_s0, 256, %s19_s21, [#allocation3], %s857_s23, %s857_s23, %s858_s24  }
  0x17   :  { %s859_s30 = smov [#allocation7]  }
  0x18   :  { %s44_s6 = sshll.u32 %s859_s30, 4  ;;  %s45_s6 = int_to_ptr.vmem [resolvable:$true] %s44_s6 }
  0x19   :  { %s817_s7 = scalar_lea.vmem %s45_s6, 4096  ;;  %p822_p11 = scmp.lt.s32.totalorder %s45_s6, %s45_s6 }
  0x1a   :  { %p818_p10 = scmp.ne.s32.totalorder %s45_s6, %s817_s7  ;;  %p823_p12 = scmp.lt.s32.totalorder %s817_s7, %s817_s7 }
  0x1c   :  { %p824_p13 = por %p823_p12, %p822_p11 }
  0x1e   :  { %p825_p0 = pnand %p824_p13, %p818_p10 }
  0x20   :  { %828 = shalt.err (!%p825_p0)
}
  0x21   :  { %50 = dma.hbm_to_vmem [thread:$0]  %s914_s3, 4096, %s45_s6, [#allocation6], %s857_s23, %s857_s23, %s858_s24  }
  0x22   :  { %849 = dma.done.wait [#allocation3], 256  }
  0x23   :  { %850 = vsyncadd [#allocation3], 4294967040 }
  0x24   :  { %851 = dma.done.wait [#allocation6], 8192  }
  0x25   :  { %852 = vsyncadd [#allocation6], 4294959104  ;;  %v670_v0 = vld [vmem:[#allocation5 + $0x74] ss:$8 sps:$4 sm:$0xff]   ;;  %v672_v1 = vld [vmem:[#allocation5 + $0x70] ss:$8 sps:$4 sm:$0xff]  }
  0x26   :  { %278 = vmatprep.subr.bf16.mxu0 %v670_v0  ;;  %v673_v2 = vld [vmem:[#allocation5 + $0x64] ss:$8 sps:$4 sm:$0xff]   ;;  %v675_v3 = vld [vmem:[#allocation5 + $0x60] ss:$8 sps:$4 sm:$0xff]   ;;  %v676_v4 = vld [vmem:[#allocation5 + $0x54] ss:$8 sps:$4 sm:$0xff]  }
  0x27   :  { %279 = vmatpush1.bf16.msra.mxu0 %v672_v1  ;;  %v678_v5 = vld [vmem:[#allocation5 + $0x50] ss:$8 sps:$4 sm:$0xff]   ;;  %v679_v6 = vld [vmem:[#allocation5 + $0x44] ss:$8 sps:$4 sm:$0xff]   ;;  %v681_v7 = vld [vmem:[#allocation5 + $0x40] ss:$8 sps:$4 sm:$0xff]  }
  0x28   :  { %280 = vmatprep.subr.bf16.mxu0 %v673_v2  ;;  %v682_v8 = vld [vmem:[#allocation5 + $0x34] ss:$8 sps:$4 sm:$0xff]   ;;  %v684_v9 = vld [vmem:[#allocation5 + $0x30] ss:$8 sps:$4 sm:$0xff]   ;;  %v685_v10 = vld [vmem:[#allocation5 + $0x24] ss:$8 sps:$4 sm:$0xff]   ;;  %v98_v2 = vlaneseq }
  0x29   :  { %v687_v11 = vld [vmem:[#allocation5 + $0x20] ss:$8 sps:$4 sm:$0xff]   ;;  %v688_v12 = vld [vmem:[#allocation5 + $0x14] ss:$8 sps:$4 sm:$0xff]   ;;  %v690_v13 = vld [vmem:[#allocation5 + $0x10] ss:$8 sps:$4 sm:$0xff]  }
  0x2a   :  { %v691_v14 = vld [vmem:[#allocation5 + $0x4] ss:$8 sps:$4 sm:$0xff]   ;;  %v720_v15 = vld [vmem:[#allocation2 + $0x4] ss:$8 sps:$4 sm:$0xff]   ;;  %v723_v17 = vld [vmem:[#allocation7 + $0x70] ss:$8 sps:$4 sm:$0xff]  }
  0x2b   :  { %281 = vmatpush1.bf16.msra.mxu0 %v675_v3  ;;  %v721_v16 = vld [vmem:[#allocation7 + $0x74] ss:$8 sps:$4 sm:$0xff]   ;;  %310 = vmatprep.mubr.bf16.mxu0 %v720_v15  ;;  %v724_v18 = vld [vmem:[#allocation7 + $0x64] ss:$8 sps:$4 sm:$0xff]   ;;  %v726_v19 = vld [vmem:[#allocation7 + $0x60] ss:$8 sps:$4 sm:$0xff]  }
  0x2c   :  { %282 = vmatprep.subr.bf16.mxu0 %v676_v4  ;;  %531 = vmatprep.subr.bf16.mxu1 %v721_v16  ;;  %v693_v20 = vld [vmem:[#allocation5] ss:$8 sps:$4 sm:$0xff]   ;;  %v727_v21 = vld [vmem:[#allocation7 + $0x54] ss:$8 sps:$4 sm:$0xff]   ;;  %v729_v23 = vld [vmem:[#allocation7 + $0x50] ss:$8 sps:$4 sm:$0xff]  }
  0x2d   :  { %532 = vmatpush1.bf16.msra.mxu1 %v723_v17  ;;  %v694_v22 = vld [vmem:[#allocation5 + $0xf4] ss:$8 sps:$4 sm:$0xff]   ;;  %v696_v24 = vld [vmem:[#allocation5 + $0xf0] ss:$8 sps:$4 sm:$0xff]   ;;  %v730_v25 = vld [vmem:[#allocation7 + $0x44] ss:$8 sps:$4 sm:$0xff]  }
  0x2e   :  { %533 = vmatprep.subr.bf16.mxu1 %v724_v18  ;;  %v697_v26 = vld [vmem:[#allocation5 + $0xe4] ss:$8 sps:$4 sm:$0xff]   ;;  %v732_v27 = vld [vmem:[#allocation7 + $0x40] ss:$8 sps:$4 sm:$0xff]   ;;  %v733_v29 = vld [vmem:[#allocation7 + $0x34] ss:$8 sps:$4 sm:$0xff]  }
  0x2f   :  { %283 = vmatpush1.bf16.msra.mxu0 %v678_v5  ;;  %v699_v28 = vld [vmem:[#allocation5 + $0xe0] ss:$8 sps:$4 sm:$0xff]   ;;  %v700_v30 = vld [vmem:[#allocation5 + $0xd4] ss:$8 sps:$4 sm:$0xff]   ;;  %v735_v31 = vld [vmem:[#allocation7 + $0x30] ss:$8 sps:$4 sm:$0xff]  }
  0x30   :  { %284 = vmatprep.subr.bf16.mxu0 %v679_v6  ;;  %v702_v32 = vld [vmem:[#allocation5 + $0xd0] ss:$8 sps:$4 sm:$0xff]   ;;  %v736_v33 = vld [vmem:[#allocation7 + $0x24] ss:$8 sps:$4 sm:$0xff]   ;;  %v738_v35 = vld [vmem:[#allocation7 + $0x20] ss:$8 sps:$4 sm:$0xff]  }
  0x31   :  { %534 = vmatpush1.bf16.msra.mxu1 %v726_v19  ;;  %v703_v34 = vld [vmem:[#allocation5 + $0xc4] ss:$8 sps:$4 sm:$0xff]   ;;  %v705_v36 = vld [vmem:[#allocation5 + $0xc0] ss:$8 sps:$4 sm:$0xff]   ;;  %v739_v37 = vld [vmem:[#allocation7 + $0x14] ss:$8 sps:$4 sm:$0xff]  }
  0x32   :  { %535 = vmatprep.subr.bf16.mxu1 %v727_v21  ;;  %v706_v38 = vld [vmem:[#allocation5 + $0xb4] ss:$8 sps:$4 sm:$0xff]   ;;  %v741_v39 = vld [vmem:[#allocation7 + $0x10] ss:$8 sps:$4 sm:$0xff]   ;;  %v742_v41 = vld [vmem:[#allocation7 + $0x4] ss:$8 sps:$4 sm:$0xff]  }
  0x33   :  { %285 = vmatpush1.bf16.msra.mxu0 %v681_v7  ;;  %v708_v40 = vld [vmem:[#allocation5 + $0xb0] ss:$8 sps:$4 sm:$0xff]   ;;  %v709_v42 = vld [vmem:[#allocation5 + $0xa4] ss:$8 sps:$4 sm:$0xff]   ;;  %v744_v43 = vld [vmem:[#allocation7] ss:$8 sps:$4 sm:$0xff]  }
  0x34   :  { %286 = vmatprep.subr.bf16.mxu0 %v682_v8  ;;  %v711_v44 = vld [vmem:[#allocation5 + $0xa0] ss:$8 sps:$4 sm:$0xff]   ;;  %v745_v45 = vld [vmem:[#allocation7 + $0xf4] ss:$8 sps:$4 sm:$0xff]   ;;  %v747_v47 = vld [vmem:[#allocation7 + $0xf0] ss:$8 sps:$4 sm:$0xff]  }
  0x35   :  { %536 = vmatpush1.bf16.msra.mxu1 %v729_v23  ;;  %v712_v46 = vld [vmem:[#allocation5 + $0x94] ss:$8 sps:$4 sm:$0xff]   ;;  %v714_v48 = vld [vmem:[#allocation5 + $0x90] ss:$8 sps:$4 sm:$0xff]   ;;  %v748_v49 = vld [vmem:[#allocation7 + $0xe4] ss:$8 sps:$4 sm:$0xff]  }
  0x36   :  { %537 = vmatprep.subr.bf16.mxu1 %v730_v25  ;;  %v715_v50 = vld [vmem:[#allocation5 + $0x84] ss:$8 sps:$4 sm:$0xff]   ;;  %v750_v51 = vld [vmem:[#allocation7 + $0xe0] ss:$8 sps:$4 sm:$0xff]   ;;  %v751_v53 = vld [vmem:[#allocation7 + $0xd4] ss:$8 sps:$4 sm:$0xff]  }
  0x37   :  { %287 = vmatpush1.bf16.msra.mxu0 %v684_v9  ;;  %v717_v52 = vld [vmem:[#allocation5 + $0x80] ss:$8 sps:$4 sm:$0xff]   ;;  %v718_v54 = vld [vmem:[#allocation2] ss:$8 sps:$4 sm:$0xff]   ;;  %v754_v56 = vld [vmem:[#allocation7 + $0xc4] ss:$8 sps:$4 sm:$0xff]  }
  0x38   :  { %288 = vmatprep.subr.bf16.mxu0 %v685_v10  ;;  %v753_v55 = vld [vmem:[#allocation7 + $0xd0] ss:$8 sps:$4 sm:$0xff]   ;;  %v756_v57 = vld [vmem:[#allocation7 + $0xc0] ss:$8 sps:$4 sm:$0xff]   ;;  %v757_v58 = vld [vmem:[#allocation7 + $0xb4] ss:$8 sps:$4 sm:$0xff]  }
  0x39   :  { %538 = vmatpush1.bf16.msra.mxu1 %v732_v27  ;;  %v759_v59 = vld [vmem:[#allocation7 + $0xb0] ss:$8 sps:$4 sm:$0xff]   ;;  %v760_v60 = vld [vmem:[#allocation7 + $0xa4] ss:$8 sps:$4 sm:$0xff]   ;;  %v762_v61 = vld [vmem:[#allocation7 + $0xa0] ss:$8 sps:$4 sm:$0xff]  }
  0x3a   :  { %539 = vmatprep.subr.bf16.mxu1 %v733_v29  ;;  %v763_v62 = vld [vmem:[#allocation7 + $0x94] ss:$8 sps:$4 sm:$0xff]   ;;  %v765_v63 = vld [vmem:[#allocation7 + $0x90] ss:$8 sps:$4 sm:$0xff]   ;;  %v766_v0 = vld [vmem:[#allocation7 + $0x84] ss:$8 sps:$4 sm:$0xff]  }
  0x3b   :  { %289 = vmatpush1.bf16.msra.mxu0 %v687_v11  ;;  %v768_v1 = vld [vmem:[#allocation7 + $0x80] ss:$8 sps:$4 sm:$0xff]   ;;  %v99_v3 = vshrl.u32 %v98_v2, 7  ;;  %v96_v6 = vld [vmem:[%s913_s2] sm:$0x3]  ;;  %s860_s10 = smov [#allocation8]  }
  0x3c   :  { %290 = vmatprep.subr.bf16.mxu0 %v688_v12  ;;  %v359_v23 = vld [vmem:[%s915_s4] sm:$0x3]  ;;  %s583_s11 = sshll.u32 %s860_s10, 4  ;;  %s584_s11 = int_to_ptr.vmem [resolvable:$true] %s583_s11 }
  0x3d   :  { %540 = vmatpush1.bf16.msra.mxu1 %v735_v31  ;;  %v104_v4 = vsub.s32 1, %v99_v3  ;;  %v100_v5 = vsub.s32 0, %v99_v3  ;;  %s829_s12 = scalar_lea.vmem %s584_s11, 512  ;;  %p834_p2 = scmp.lt.s32.totalorder %s584_s11, %s584_s11 }
  0x3e   :  { %541 = vmatprep.subr.bf16.mxu1 %v736_v33  ;;  %p830_p1 = scmp.ne.s32.totalorder %s584_s11, %s829_s12  ;;  %p835_p3 = scmp.lt.s32.totalorder %s829_s12, %s829_s12 }
  0x3f   :  { %291 = vmatpush1.bf16.msra.mxu0 %v690_v13  ;;  %v105_v8 = vrot.slane %v96_v6, %v104_v4  ;;  %v101_v9 = vrot.slane %v96_v6, %v100_v5  ;;  %v368_v25 = vrot.slane %v359_v23, %v104_v4 }
  0x40   :  { %292 = vmatprep.subr.bf16.mxu0 %v691_v14  ;;  %p836_p4 = por %p835_p3, %p834_p2 }
  0x41   :  { %542 = vmatpush1.bf16.msra.mxu1 %v738_v35 }
  0x42   :  { %543 = vmatprep.subr.bf16.mxu1 %v739_v37  ;;  %p837_p5 = pnand %p836_p4, %p830_p1 }
  0x43   :  { %293 = vmatpush1.bf16.msra.mxu0 %v693_v20 }
  0x44   :  { %294 = vmatprep.subr.bf16.mxu0 %v694_v22 }
  0x45   :  { %544 = vmatpush1.bf16.msra.mxu1 %v741_v39 }
  0x46   :  { %545 = vmatprep.subr.bf16.mxu1 %v742_v41 }
  0x47   :  { %295 = vmatpush2.bf16.msra.mxu0 %v696_v24  ;;  %v364_v24 = vrot.slane %v359_v23, %v100_v5 }
  0x48   :  { %296 = vmatprep.subr.bf16.mxu0 %v697_v26 }
  0x49   :  { %546 = vmatpush1.bf16.msra.mxu1 %v744_v43 }
  0x4a   :  { %547 = vmatprep.subr.bf16.mxu1 %v745_v45 }
  0x4b   :  { %297 = vmatpush2.bf16.msra.mxu0 %v699_v28 }
  0x4c   :  { %298 = vmatprep.subr.bf16.mxu0 %v700_v30 }
  0x4d   :  { %548 = vmatpush2.bf16.msra.mxu1 %v747_v47 }
  0x4e   :  { %549 = vmatprep.subr.bf16.mxu1 %v748_v49 }
  0x4f   :  { %299 = vmatpush2.bf16.msra.mxu0 %v702_v32 }
  0x50   :  { %300 = vmatprep.subr.bf16.mxu0 %v703_v34 }
  0x51   :  { %550 = vmatpush2.bf16.msra.mxu1 %v750_v51 }
  0x52   :  { %551 = vmatprep.subr.bf16.mxu1 %v751_v53 }
  0x53   :  { %301 = vmatpush2.bf16.msra.mxu0 %v705_v36 }
  0x54   :  { %302 = vmatprep.subr.bf16.mxu0 %v706_v38 }
  0x55   :  { %552 = vmatpush2.bf16.msra.mxu1 %v753_v55 }
  0x56   :  { %553 = vmatprep.subr.bf16.mxu1 %v754_v56 }
  0x57   :  { %303 = vmatpush2.bf16.msra.mxu0 %v708_v40 }
  0x58   :  { %304 = vmatprep.subr.bf16.mxu0 %v709_v42 }
  0x59   :  { %554 = vmatpush2.bf16.msra.mxu1 %v756_v57 }
  0x5a   :  { %555 = vmatprep.subr.bf16.mxu1 %v757_v58 }
  0x5b   :  { %305 = vmatpush2.bf16.msra.mxu0 %v711_v44 }
  0x5c   :  { %306 = vmatprep.subr.bf16.mxu0 %v712_v46 }
  0x5d   :  { %556 = vmatpush2.bf16.msra.mxu1 %v759_v59 }
  0x5e   :  { %557 = vmatprep.subr.bf16.mxu1 %v760_v60 }
  0x5f   :  { %307 = vmatpush2.bf16.msra.mxu0 %v714_v48 }
  0x60   :  { %308 = vmatprep.subr.bf16.mxu0 %v715_v50 }
  0x61   :  { %558 = vmatpush2.bf16.msra.mxu1 %v762_v61 }
  0x62   :  { %559 = vmatprep.subr.bf16.mxu1 %v763_v62 }
  0x63   :  { %309 = vmatpush2.bf16.msra.mxu0 %v717_v52 }
  0x65   :  { %560 = vmatpush2.bf16.msra.mxu1 %v765_v63 }
  0x66   :  { %311 = vmatmul.mubr.bf16.vlgmr.msra.gmra.mxu0 %v718_v54  ;;  %561 = vmatprep.subr.bf16.mxu1 %v766_v0 }
  0x69   :  { %562 = vmatpush2.bf16.msra.mxu1 %v768_v1 }
 0x126   :  { %v312_v7 = vpop.f32.mrf.mxu0 }
 0x127   :  { %v313_v14 = vadd.f32 %v312_v7, %v101_v9 }
 0x128   :  { %v314_v10 = vpop.f32.mrf.mxu0 }
 0x129   :  { %v315_v12 = vadd.f32 %v314_v10, %v105_v8  ;;  %v321_v20 = vmax.f32 %v313_v14, 0.0 }
 0x12a   :  { %v316_v11 = vpop.f32.mrf.mxu0 }
 0x12b   :  { %v317_v13 = vadd.f32 %v316_v11, %v101_v9  ;;  %v322_v18 = vmax.f32 %v315_v12, 0.0 }
 0x12c   :  { %v318_v15 = vpop.f32.mrf.mxu0 }
 0x12d   :  { %v319_v16 = vadd.f32 %v318_v15, %v105_v8  ;;  %v323_v17 = vmax.f32 %v317_v13, 0.0 }
 0x12f   :  { %v324_v19 = vmax.f32 %v319_v16, 0.0  ;;  %v325_v22 = vpack.c.bf16 %v323_v17, %v321_v20 }
 0x131   :  { %v326_v21 = vpack.c.bf16 %v324_v19, %v322_v18 }
 0x133   :  { %563 = vmatprep.mubr.bf16.mxu1 %v326_v21 }
 0x134   :  { %564 = vmatmul.mubr.bf16.vlgmr.msra.gmra.mxu1 %v325_v22 }
 0x1f4   :  { %v565_v26 = vpop.f32.mrf.mxu1 }
 0x1f5   :  { %v566_v27 = vadd.f32 %v565_v26, %v364_v24 }
 0x1f6   :  { %v567_v28 = vpop.f32.mrf.mxu1 }
 0x1f7   :  { %574 = vst [vmem:[#allocation8] sm:$0xff] %v566_v27  ;;  %v568_v29 = vadd.f32 %v567_v28, %v368_v25 }
 0x1f8   :  { %v569_v30 = vpop.f32.mrf.mxu1 }
 0x1f9   :  { %575 = vst [vmem:[#allocation8 + $0x8] sm:$0xff] %v568_v29  ;;  %v570_v31 = vadd.f32 %v569_v30, %v364_v24 }
 0x1fa   :  { %v571_v32 = vpop.f32.mrf.mxu1 }
 0x1fb   :  { %576 = vst [vmem:[#allocation8 + $0x10] sm:$0xff] %v570_v31  ;;  %v572_v33 = vadd.f32 %v571_v32, %v368_v25 }
 0x1fd   :  { %577 = vst [vmem:[#allocation8 + $0x18] sm:$0xff] %v572_v33 }
 0x1fe   :  { %840 = shalt.err (!%p837_p5)
}
 0x1ff   :  { %s861_s4 = smov 256   ;;  %s862_s13 = smov 16  }
 0x200   :  { %589 = dma.vmem_to_hbm [thread:$0]  %s584_s11, 512, %s916_s5, [#allocation4], %s861_s4, %s861_s4, %s862_s13  }
 0x201   :  { %853 = dma.done.wait [#allocation4], 512  }
 0x202   :  { %854 = vsyncadd [#allocation4], 4294966784 }
 0x203   :  { %593 = vsyncpa [#allocation3], 1 }
 0x204   :  { %594 = vsyncpa [#allocation6], 1 }
 0x205   :  { %595 = vsyncpa [#allocation4], 1 }

</bundles_post_ra>
